<compile_context>
chip_gen: v5e
topology: v5e:2x2
jax: 0.10.0
libtpu: 0.0.40
codegen_flags: <defaults>
</compile_context>

<pallas_src>
import jax
import jax.numpy as jnp
from jax.experimental import pallas as pl
from jax.experimental.pallas import tpu as pltpu

LANE = 128  # pad channel dims to this so the last dim is lane-dense


def _gelu(x):
    # TODO(synk): PyTorch nn.GELU() default is the exact erf form; the tanh
    # approximation is used for guaranteed Mosaic lowering (~1e-3 relative diff).
    return jax.nn.gelu(x, approximate=True)


def _kernel(x_ref, pool_ref, w1_ref, b1_ref, w2_ref, b2_ref,
            w3_ref, b3_ref, w4_ref, b4_ref, o_ref):
    f32, bf16 = jnp.float32, jnp.bfloat16
    x = x_ref[...]                                                        # (B*N, CP) bf16
    # proj_in Linear #1 + GELU (bias add / GELU in f32)
    h = _gelu(jnp.dot(x, w1_ref[...], preferred_element_type=f32) + b1_ref[...])
    # AvgPool2d(2,2) as a block-diagonal pooling matmul, commuted BEFORE the
    # second proj_in Linear (exact since pooling is linear and rows sum to 1).
    ph = jnp.dot(pool_ref[...], h.astype(bf16), preferred_element_type=f32)   # (B*Nout, CP)
    p = jnp.dot(ph.astype(bf16), w2_ref[...], preferred_element_type=f32) + b2_ref[...]
    # proj_out: Linear -> GELU -> Linear
    g = _gelu(jnp.dot(p.astype(bf16), w3_ref[...], preferred_element_type=f32) + b3_ref[...])
    o_ref[...] = (jnp.dot(g.astype(bf16), w4_ref[...], preferred_element_type=f32)
                  + b4_ref[...]).astype(o_ref.dtype)


def make_pool_matrix(h, w):
    """(Nout, N) matrix implementing AvgPool2d(2,2) on row-major (h, w) tokens."""
    # TODO(synk): PyTorch AvgPool2d(2,2) floors odd spatial dims; this path assumes even H, W.
    assert h % 2 == 0 and w % 2 == 0, "AvgPool2d(2,2) path assumes even H, W"
    n = h * w
    ids = jnp.arange(n)
    r, c = ids // w, ids % w
    q_of_n = (r // 2) * (w // 2) + (c // 2)      # pooled token fed by each input token
    n_out = (h // 2) * (w // 2)
    return (jnp.arange(n_out)[:, None] == q_of_n[None, :]).astype(jnp.float32) * 0.25


def _pad2(a, rows, cols):
    return jnp.pad(a, ((0, rows - a.shape[0]), (0, cols - a.shape[1])))


def cheap_simple_block(x, w1, b1, w2, b2, w3, b3, w4, b4, *, grid_h, grid_w):
    """x: (B, N, Cin) with N = grid_h * grid_w.  Returns (B, N//4, Cout)."""
    B, N, Cin = x.shape
    Cout = w4.shape[1]
    Nout = (grid_h // 2) * (grid_w // 2)
    CP = max(LANE, ((max(Cin, Cout) + LANE - 1) // LANE) * LANE)  # lane-dense channels
    M, Mo = B * N, B * Nout

    # --- wrapper-side layout plumbing: fold batch, zero-pad channels, bf16 cast ---
    xp = _pad2(x.reshape(M, Cin), M, CP).astype(jnp.bfloat16)
    pool = jnp.kron(jnp.eye(B, dtype=jnp.float32),
                    make_pool_matrix(grid_h, grid_w)).astype(jnp.bfloat16)     # (Mo, M)
    w1p = _pad2(w1, CP, CP).astype(jnp.bfloat16)
    w2p = _pad2(w2, CP, CP).astype(jnp.bfloat16)
    w3p = _pad2(w3, CP, CP).astype(jnp.bfloat16)
    w4p = _pad2(w4, CP, CP).astype(jnp.bfloat16)
    b1p = _pad2(b1, 1, CP).astype(jnp.float32)
    b2p = _pad2(b2, 1, CP).astype(jnp.float32)
    b3p = _pad2(b3, 1, CP).astype(jnp.float32)
    b4p = _pad2(b4, 1, CP).astype(jnp.float32)

    operands = (xp, pool, w1p, b1p, w2p, b2p, w3p, b3p, w4p, b4p)

    flops = 2 * (M * CP * CP + Mo * M * CP + 3 * Mo * CP * CP)
    transcendentals = M * CP + Mo * CP
    bytes_accessed = sum(int(a.size) * a.dtype.itemsize for a in operands) + Mo * CP * 4

    def full2d(arr):
        return pl.BlockSpec(arr.shape, lambda i: (0, 0))

    # Single grid step: the whole (batch-folded) problem fits comfortably in
    # VMEM at these shapes and avoids per-step (~0.35 us) pipeline overhead.
    # TODO(synk): on v7x (2 TensorCores) a token-split "parallel" grid axis of
    # size 2 would keep both cores busy; not worth it at these toy shapes.
    out = pl.pallas_call(
        _kernel,
        out_shape=jax.ShapeDtypeStruct((Mo, CP), jnp.float32),
        grid=(1,),
        in_specs=[full2d(a) for a in operands],
        out_specs=pl.BlockSpec((Mo, CP), lambda i: (0, 0)),
        compiler_params=pltpu.CompilerParams(dimension_semantics=("arbitrary",)),
        cost_estimate=pl.CostEstimate(flops=flops,
                                      transcendentals=transcendentals,
                                      bytes_accessed=bytes_accessed),
    )(*operands)

    # Drop channel padding and un-fold batch.
    return out[:, :Cout].reshape(B, Nout, Cout)


def reference(x, pool, w1, b1, w2, b2, w3, b3, w4, b4):
    """Pure-JAX f32 reference following the module literally (pool after w2)."""
    h = _gelu(x @ w1 + b1)
    h = h @ w2 + b2
    p = jnp.einsum("qn,bnc->bqc", pool, h)
    g = _gelu(p @ w3 + b3)
    return g @ w4 + b4


if __name__ == "__main__":
    # Small shapes consistent with the module: B=2, 8x8 token grid (N=64),
    # in_channels=32, out_channels=64, num_in_block=0, num_out_block=0.
    B, H, W, Cin, Cout = 2, 8, 8, 32, 64
    N = H * W

    key = jax.random.PRNGKey(0)
    ks = jax.random.split(key, 9)
    x = jax.random.normal(ks[0], (B, N, Cin), dtype=jnp.float32)

    scale = 0.05
    # Linear weights stored as (in, out) so the kernel does x @ W directly
    # (PyTorch nn.Linear stores (out, in); transpose when porting real weights).
    w1 = scale * jax.random.normal(ks[1], (Cin, Cin), dtype=jnp.float32)
    b1 = scale * jax.random.normal(ks[2], (1, Cin), dtype=jnp.float32)
    w2 = scale * jax.random.normal(ks[3], (Cin, Cin), dtype=jnp.float32)
    b2 = scale * jax.random.normal(ks[4], (1, Cin), dtype=jnp.float32)
    w3 = scale * jax.random.normal(ks[5], (Cin, Cout), dtype=jnp.float32)
    b3 = scale * jax.random.normal(ks[6], (1, Cout), dtype=jnp.float32)
    w4 = scale * jax.random.normal(ks[7], (Cout, Cout), dtype=jnp.float32)
    b4 = scale * jax.random.normal(ks[8], (1, Cout), dtype=jnp.float32)

    out = cheap_simple_block(x, w1, b1, w2, b2, w3, b3, w4, b4, grid_h=H, grid_w=W)
    out = jax.block_until_ready(out)

    ref = reference(x, make_pool_matrix(H, W), w1, b1, w2, b2, w3, b3, w4, b4)
    assert out.shape == (B, (H // 2) * (W // 2), Cout)
    # bf16 matmul operands (f32 accumulation) vs pure-f32 reference.
    assert jnp.allclose(out, ref, atol=1e-2, rtol=1e-2), "mismatch vs JAX reference"

    print("KERNEL_OK")
</pallas_src>

<mosaic_0001>
module attributes {stable_mosaic.version = 11 : i64} {
  func.func @_kernel(%arg0: i32, %arg1: memref<128x128xbf16, #tpu.memory_space<vmem>>, %arg2: memref<32x128xbf16, #tpu.memory_space<vmem>>, %arg3: memref<128x128xbf16, #tpu.memory_space<vmem>>, %arg4: memref<1x128xf32, #tpu.memory_space<vmem>>, %arg5: memref<128x128xbf16, #tpu.memory_space<vmem>>, %arg6: memref<1x128xf32, #tpu.memory_space<vmem>>, %arg7: memref<128x128xbf16, #tpu.memory_space<vmem>>, %arg8: memref<1x128xf32, #tpu.memory_space<vmem>>, %arg9: memref<128x128xbf16, #tpu.memory_space<vmem>>, %arg10: memref<1x128xf32, #tpu.memory_space<vmem>>, %arg11: memref<32x128xf32, #tpu.memory_space<vmem>>) attributes {dimension_semantics = [#tpu.dimension_semantics<arbitrary>], iteration_bounds = array<i64: 1>, scalar_prefetch = 0 : i64, scratch_operands = 0 : i64, tpu.core_type = #tpu.core_type<tc>, window_params = [{pipeline_mode = #tpu.pipeline_mode<synchronous>, transform_indices = @transform_0, window_bounds = array<i64: 128, 128>}, {pipeline_mode = #tpu.pipeline_mode<synchronous>, transform_indices = @transform_1, window_bounds = array<i64: 32, 128>}, {pipeline_mode = #tpu.pipeline_mode<synchronous>, transform_indices = @transform_2, window_bounds = array<i64: 128, 128>}, {pipeline_mode = #tpu.pipeline_mode<synchronous>, transform_indices = @transform_3, window_bounds = array<i64: 1, 128>}, {pipeline_mode = #tpu.pipeline_mode<synchronous>, transform_indices = @transform_4, window_bounds = array<i64: 128, 128>}, {pipeline_mode = #tpu.pipeline_mode<synchronous>, transform_indices = @transform_5, window_bounds = array<i64: 1, 128>}, {pipeline_mode = #tpu.pipeline_mode<synchronous>, transform_indices = @transform_6, window_bounds = array<i64: 128, 128>}, {pipeline_mode = #tpu.pipeline_mode<synchronous>, transform_indices = @transform_7, window_bounds = array<i64: 1, 128>}, {pipeline_mode = #tpu.pipeline_mode<synchronous>, transform_indices = @transform_8, window_bounds = array<i64: 128, 128>}, {pipeline_mode = #tpu.pipeline_mode<synchronous>, transform_indices = @transform_9, window_bounds = array<i64: 1, 128>}, {pipeline_mode = #tpu.pipeline_mode<synchronous>, transform_indices = @transform_10, window_bounds = array<i64: 32, 128>}]} {
    %c0 = arith.constant 0 : index
    %c0_0 = arith.constant 0 : index
    %0 = vector.load %arg1[%c0, %c0_0] : memref<128x128xbf16, #tpu.memory_space<vmem>>, vector<128x128xbf16>
    %c0_1 = arith.constant 0 : index
    %c0_2 = arith.constant 0 : index
    %1 = vector.load %arg3[%c0_1, %c0_2] : memref<128x128xbf16, #tpu.memory_space<vmem>>, vector<128x128xbf16>
    %cst = arith.constant dense<0.000000e+00> : vector<128x128xf32>
    %2 = tpu.matmul %0, %1, %cst {dimension_numbers = #tpu.dot_dimension_numbers<[1], [0], [0], [1], [0, 0, 1, 1], [], []>} : vector<128x128xbf16>, vector<128x128xbf16>, vector<128x128xf32> -> vector<128x128xf32>
    %c0_3 = arith.constant 0 : index
    %c0_4 = arith.constant 0 : index
    %3 = vector.load %arg4[%c0_3, %c0_4] : memref<1x128xf32, #tpu.memory_space<vmem>>, vector<1x128xf32>
    %4 = vector.broadcast %3 : vector<1x128xf32> to vector<128x128xf32>
    %5 = arith.addf %2, %4 : vector<128x128xf32>
    %6 = arith.mulf %5, %5 : vector<128x128xf32>
    %7 = arith.mulf %5, %6 : vector<128x128xf32>
    %cst_5 = arith.constant 4.471500e-02 : f32
    %8 = vector.broadcast %cst_5 : f32 to vector<128x128xf32>
    %9 = arith.mulf %8, %7 : vector<128x128xf32>
    %10 = arith.addf %5, %9 : vector<128x128xf32>
    %cst_6 = arith.constant 0.797884583 : f32
    %11 = vector.broadcast %cst_6 : f32 to vector<128x128xf32>
    %12 = arith.mulf %11, %10 : vector<128x128xf32>
    %13 = math.tanh %12 : vector<128x128xf32>
    %cst_7 = arith.constant 1.000000e+00 : f32
    %14 = vector.broadcast %cst_7 : f32 to vector<128x128xf32>
    %15 = arith.addf %14, %13 : vector<128x128xf32>
    %cst_8 = arith.constant 5.000000e-01 : f32
    %16 = vector.broadcast %cst_8 : f32 to vector<128x128xf32>
    %17 = arith.mulf %16, %15 : vector<128x128xf32>
    %18 = arith.mulf %5, %17 : vector<128x128xf32>
    %c0_9 = arith.constant 0 : index
    %c0_10 = arith.constant 0 : index
    %19 = vector.load %arg2[%c0_9, %c0_10] : memref<32x128xbf16, #tpu.memory_space<vmem>>, vector<32x128xbf16>
    %20 = arith.truncf %18 : vector<128x128xf32> to vector<128x128xbf16>
    %cst_11 = arith.constant dense<0.000000e+00> : vector<32x128xf32>
    %21 = tpu.matmul %19, %20, %cst_11 {dimension_numbers = #tpu.dot_dimension_numbers<[1], [0], [0], [1], [0, 0, 1, 1], [], []>} : vector<32x128xbf16>, vector<128x128xbf16>, vector<32x128xf32> -> vector<32x128xf32>
    %22 = arith.truncf %21 : vector<32x128xf32> to vector<32x128xbf16>
    %c0_12 = arith.constant 0 : index
    %c0_13 = arith.constant 0 : index
    %23 = vector.load %arg5[%c0_12, %c0_13] : memref<128x128xbf16, #tpu.memory_space<vmem>>, vector<128x128xbf16>
    %cst_14 = arith.constant dense<0.000000e+00> : vector<32x128xf32>
    %24 = tpu.matmul %22, %23, %cst_14 {dimension_numbers = #tpu.dot_dimension_numbers<[1], [0], [0], [1], [0, 0, 1, 1], [], []>} : vector<32x128xbf16>, vector<128x128xbf16>, vector<32x128xf32> -> vector<32x128xf32>
    %c0_15 = arith.constant 0 : index
    %c0_16 = arith.constant 0 : index
    %25 = vector.load %arg6[%c0_15, %c0_16] : memref<1x128xf32, #tpu.memory_space<vmem>>, vector<1x128xf32>
    %26 = vector.broadcast %25 : vector<1x128xf32> to vector<32x128xf32>
    %27 = arith.addf %24, %26 : vector<32x128xf32>
    %28 = arith.truncf %27 : vector<32x128xf32> to vector<32x128xbf16>
    %c0_17 = arith.constant 0 : index
    %c0_18 = arith.constant 0 : index
    %29 = vector.load %arg7[%c0_17, %c0_18] : memref<128x128xbf16, #tpu.memory_space<vmem>>, vector<128x128xbf16>
    %cst_19 = arith.constant dense<0.000000e+00> : vector<32x128xf32>
    %30 = tpu.matmul %28, %29, %cst_19 {dimension_numbers = #tpu.dot_dimension_numbers<[1], [0], [0], [1], [0, 0, 1, 1], [], []>} : vector<32x128xbf16>, vector<128x128xbf16>, vector<32x128xf32> -> vector<32x128xf32>
    %c0_20 = arith.constant 0 : index
    %c0_21 = arith.constant 0 : index
    %31 = vector.load %arg8[%c0_20, %c0_21] : memref<1x128xf32, #tpu.memory_space<vmem>>, vector<1x128xf32>
    %32 = vector.broadcast %31 : vector<1x128xf32> to vector<32x128xf32>
    %33 = arith.addf %30, %32 : vector<32x128xf32>
    %34 = arith.mulf %33, %33 : vector<32x128xf32>
    %35 = arith.mulf %33, %34 : vector<32x128xf32>
    %cst_22 = arith.constant 4.471500e-02 : f32
    %36 = vector.broadcast %cst_22 : f32 to vector<32x128xf32>
    %37 = arith.mulf %36, %35 : vector<32x128xf32>
    %38 = arith.addf %33, %37 : vector<32x128xf32>
    %cst_23 = arith.constant 0.797884583 : f32
    %39 = vector.broadcast %cst_23 : f32 to vector<32x128xf32>
    %40 = arith.mulf %39, %38 : vector<32x128xf32>
    %41 = math.tanh %40 : vector<32x128xf32>
    %cst_24 = arith.constant 1.000000e+00 : f32
    %42 = vector.broadcast %cst_24 : f32 to vector<32x128xf32>
    %43 = arith.addf %42, %41 : vector<32x128xf32>
    %cst_25 = arith.constant 5.000000e-01 : f32
    %44 = vector.broadcast %cst_25 : f32 to vector<32x128xf32>
    %45 = arith.mulf %44, %43 : vector<32x128xf32>
    %46 = arith.mulf %33, %45 : vector<32x128xf32>
    %47 = arith.truncf %46 : vector<32x128xf32> to vector<32x128xbf16>
    %c0_26 = arith.constant 0 : index
    %c0_27 = arith.constant 0 : index
    %48 = vector.load %arg9[%c0_26, %c0_27] : memref<128x128xbf16, #tpu.memory_space<vmem>>, vector<128x128xbf16>
    %cst_28 = arith.constant dense<0.000000e+00> : vector<32x128xf32>
    %49 = tpu.matmul %47, %48, %cst_28 {dimension_numbers = #tpu.dot_dimension_numbers<[1], [0], [0], [1], [0, 0, 1, 1], [], []>} : vector<32x128xbf16>, vector<128x128xbf16>, vector<32x128xf32> -> vector<32x128xf32>
    %c0_29 = arith.constant 0 : index
    %c0_30 = arith.constant 0 : index
    %50 = vector.load %arg10[%c0_29, %c0_30] : memref<1x128xf32, #tpu.memory_space<vmem>>, vector<1x128xf32>
    %51 = vector.broadcast %50 : vector<1x128xf32> to vector<32x128xf32>
    %52 = arith.addf %49, %51 : vector<32x128xf32>
    %c0_31 = arith.constant 0 : index
    %c0_32 = arith.constant 0 : index
    %53 = vector.load %arg11[%c0_31, %c0_32] : memref<32x128xf32, #tpu.memory_space<vmem>>, vector<32x128xf32>
    tpu.vector_store %arg11[%c0_31, %c0_32], %52 {strides = array<i32>} : memref<32x128xf32, #tpu.memory_space<vmem>>, vector<32x128xf32>,
    return
  }
  func.func @transform_0(%arg0: i32) -> (i32, i32) {
    %c0_i32 = arith.constant 0 : i32
    %c0_i32_0 = arith.constant 0 : i32
    %c0_i32_1 = arith.constant 0 : i32
    return %c0_i32, %c0_i32_0 : i32, i32
  }
  func.func @transform_1(%arg0: i32) -> (i32, i32) {
    %c0_i32 = arith.constant 0 : i32
    %c0_i32_0 = arith.constant 0 : i32
    %c0_i32_1 = arith.constant 0 : i32
    return %c0_i32, %c0_i32_0 : i32, i32
  }
  func.func @transform_2(%arg0: i32) -> (i32, i32) {
    %c0_i32 = arith.constant 0 : i32
    %c0_i32_0 = arith.constant 0 : i32
    %c0_i32_1 = arith.constant 0 : i32
    return %c0_i32, %c0_i32_0 : i32, i32
  }
  func.func @transform_3(%arg0: i32) -> (i32, i32) {
    %c0_i32 = arith.constant 0 : i32
    %c0_i32_0 = arith.constant 0 : i32
    %c0_i32_1 = arith.constant 0 : i32
    return %c0_i32, %c0_i32_0 : i32, i32
  }
  func.func @transform_4(%arg0: i32) -> (i32, i32) {
    %c0_i32 = arith.constant 0 : i32
    %c0_i32_0 = arith.constant 0 : i32
    %c0_i32_1 = arith.constant 0 : i32
    return %c0_i32, %c0_i32_0 : i32, i32
  }
  func.func @transform_5(%arg0: i32) -> (i32, i32) {
    %c0_i32 = arith.constant 0 : i32
    %c0_i32_0 = arith.constant 0 : i32
    %c0_i32_1 = arith.constant 0 : i32
    return %c0_i32, %c0_i32_0 : i32, i32
  }
  func.func @transform_6(%arg0: i32) -> (i32, i32) {
    %c0_i32 = arith.constant 0 : i32
    %c0_i32_0 = arith.constant 0 : i32
    %c0_i32_1 = arith.constant 0 : i32
    return %c0_i32, %c0_i32_0 : i32, i32
  }
  func.func @transform_7(%arg0: i32) -> (i32, i32) {
    %c0_i32 = arith.constant 0 : i32
    %c0_i32_0 = arith.constant 0 : i32
    %c0_i32_1 = arith.constant 0 : i32
    return %c0_i32, %c0_i32_0 : i32, i32
  }
  func.func @transform_8(%arg0: i32) -> (i32, i32) {
    %c0_i32 = arith.constant 0 : i32
    %c0_i32_0 = arith.constant 0 : i32
    %c0_i32_1 = arith.constant 0 : i32
    return %c0_i32, %c0_i32_0 : i32, i32
  }
  func.func @transform_9(%arg0: i32) -> (i32, i32) {
    %c0_i32 = arith.constant 0 : i32
    %c0_i32_0 = arith.constant 0 : i32
    %c0_i32_1 = arith.constant 0 : i32
    return %c0_i32, %c0_i32_0 : i32, i32
  }
  func.func @transform_10(%arg0: i32) -> (i32, i32) {
    %c0_i32 = arith.constant 0 : i32
    %c0_i32_0 = arith.constant 0 : i32
    %c0_i32_1 = arith.constant 0 : i32
    return %c0_i32, %c0_i32_0 : i32, i32
  }
}

</mosaic_0001>

<bundles_post_ra>
// kernel: tpu_custom_call.1
= control target key start
LH: loop header
LB: loop body
LE: loop exit
PB: predicated region body
PF: predicated region fallthrough
CT: control target
= control target key end

     0   :  { %15 = vsyncpa [#allocation3], 0  ;;  %s1542_s0 = inlined_call_operand.hbm [shape: bf16[128,128], index: 0, kind: input, shape index: {}]   ;;  %s1543_s1 = inlined_call_operand.hbm [shape: bf16[32,128], index: 1, kind: input, shape index: {}]   ;;  %s1544_s2 = inlined_call_operand.hbm [shape: bf16[128,128], index: 2, kind: input, shape index: {}]   ;;  %s1545_s3 = inlined_call_operand.vmem [shape: f32[1,128], index: 3, kind: input, shape index: {}]   ;;  %s1546_s4 = inlined_call_operand.hbm [shape: bf16[128,128], index: 4, kind: input, shape index: {}]   ;;  %s1547_s5 = inlined_call_operand.vmem [shape: f32[1,128], index: 5, kind: input, shape index: {}]   ;;  %s1548_s6 = inlined_call_operand.hbm [shape: bf16[128,128], index: 6, kind: input, shape index: {}]   ;;  %s1549_s7 = inlined_call_operand.vmem [shape: f32[1,128], index: 7, kind: input, shape index: {}]   ;;  %s1550_s8 = inlined_call_operand.hbm [shape: bf16[128,128], index: 8, kind: input, shape index: {}]   ;;  %s1551_s9 = inlined_call_operand.vmem [shape: f32[1,128], index: 9, kind: input, shape index: {}]   ;;  %s1552_s10 = inlined_call_operand.hbm [shape: f32[32,128], index: 10, kind: output, shape index: {}]  }
   0x1   :  { %16 = vsyncpa [#allocation6], 0 }
   0x2   :  { %17 = vsyncpa [#allocation9], 0 }
   0x3   :  { %18 = vsyncpa [#allocation12], 0 }
   0x4   :  { %19 = vsyncpa [#allocation4], 0  ;;  %s37_s15 = sshll.u32 %s1543_s1, 4  ;;  %s1286_s16 = smov [#allocation5]   ;;  %s38_s15 = int_to_ptr.hbm [resolvable:$true] %s37_s15 }
   0x5   :  { %s39_s17 = sshll.u32 %s1286_s16, 4  ;;  %s65_s20 = sshll.u32 %s1546_s4, 4  ;;  %s40_s17 = int_to_ptr.vmem [resolvable:$true] %s39_s17  ;;  %s66_s20 = int_to_ptr.hbm [resolvable:$true] %s65_s20 }
   0x6   :  { %s1287_s21 = smov 64   ;;  %s1288_s22 = smov 4  }
   0x7   :  { %45 = dma.hbm_to_vmem [thread:$0]  %s38_s15, 256, %s40_s17, [#allocation6], %s1287_s21, %s1287_s21, %s1288_s22  }
   0x8   :  { %s1289_s23 = smov [#allocation8]   ;;  %s24_s1 = sshll.u32 %s1542_s0, 4  ;;  %s25_s1 = int_to_ptr.hbm [resolvable:$true] %s24_s1 }
   0x9   :  { %s67_s24 = sshll.u32 %s1289_s23, 4  ;;  %s50_s28 = sshll.u32 %s1544_s2, 4  ;;  %s68_s24 = int_to_ptr.vmem [resolvable:$true] %s67_s24  ;;  %s51_s28 = int_to_ptr.hbm [resolvable:$true] %s50_s28 }
   0xa   :  { %73 = dma.hbm_to_vmem [thread:$0]  %s66_s20, 1024, %s68_s24, [#allocation9], %s1287_s21, %s1287_s21, %s1288_s22  }
   0xb   :  { %s1290_s29 = smov [#allocation2]   ;;  %s1291_s11 = smov [#allocation7]  }
   0xc   :  { %s26_s30 = sshll.u32 %s1290_s29, 4  ;;  %s52_s0 = sshll.u32 %s1291_s11, 4  ;;  %s27_s30 = int_to_ptr.vmem [resolvable:$true] %s26_s30  ;;  %s53_s0 = int_to_ptr.vmem [resolvable:$true] %s52_s0 }
   0xd   :  { %32 = dma.hbm_to_vmem [thread:$0]  %s25_s1, 1024, %s27_s30, [#allocation3], %s1287_s21, %s1287_s21, %s1288_s22  }
   0xe   :  { %s80_s14 = sshll.u32 %s1548_s6, 4  ;;  %s95_s16 = sshll.u32 %s1550_s8, 4  ;;  %s81_s14 = int_to_ptr.hbm [resolvable:$true] %s80_s14  ;;  %s96_s16 = int_to_ptr.hbm [resolvable:$true] %s95_s16 }
   0xf   :  { %58 = dma.hbm_to_vmem [thread:$0]  %s51_s28, 1024, %s53_s0, [#allocation6], %s1287_s21, %s1287_s21, %s1288_s22  }
  0x10   :  { %s1292_s17 = smov [#allocation10]   ;;  %s1293_s19 = smov [#allocation11]  }
  0x11   :  { %s82_s18 = sshll.u32 %s1292_s17, 4  ;;  %s97_s6 = sshll.u32 %s1293_s19, 4  ;;  %s83_s18 = int_to_ptr.vmem [resolvable:$true] %s82_s18  ;;  %s98_s6 = int_to_ptr.vmem [resolvable:$true] %s97_s6 }
  0x12   :  { %88 = dma.hbm_to_vmem [thread:$0]  %s81_s14, 1024, %s83_s18, [#allocation9], %s1287_s21, %s1287_s21, %s1288_s22  }
  0x13   :  { %103 = dma.hbm_to_vmem [thread:$0]  %s96_s16, 1024, %s98_s6, [#allocation12], %s1287_s21, %s1287_s21, %s1288_s22  }
  0x14   :  { %1276 = dma.done.wait [#allocation3], 1024  }
  0x15   :  { %1277 = vsyncadd [#allocation3], 4294966272 }
  0x16   :  { %1278 = dma.done.wait [#allocation6], 1280  }
  0x17   :  { %1279 = vsyncadd [#allocation6], 4294966016 }
  0x18   :  { %1280 = dma.done.wait [#allocation9], 2048  }
  0x19   :  { %1281 = vsyncadd [#allocation9], 4294965248 }
  0x1a   :  { %1282 = dma.done.wait [#allocation12], 1024  }
  0x1b   :  { %1283 = vsyncadd [#allocation12], 4294966272  ;;  %v1010_v0 = vld [vmem:[#allocation7 + $0x38] sm:$0xff]  ;;  %v1009_v1 = vld [vmem:[#allocation7 + $0x30] sm:$0xff]  ;;  %s1294_s24 = smov [#allocation13]   ;;  %s811_s4 = sshll.u32 %s1552_s10, 4  ;;  %s812_s4 = int_to_ptr.hbm [resolvable:$true] %s811_s4 }
  0x1c   :  { %262 = vmatpush.bf16.msra.mxu0 %v1010_v0  ;;  %1037 = vmatpush.bf16.msra.mxu2 %v1010_v0  ;;  %v1008_v2 = vld [vmem:[#allocation7 + $0x28] sm:$0xff]  ;;  %v1007_v3 = vld [vmem:[#allocation7 + $0x20] sm:$0xff]  ;;  %v1006_v4 = vld [vmem:[#allocation7 + $0x18] sm:$0xff]  ;;  %s809_s25 = sshll.u32 %s1294_s24, 4  ;;  %s1296_s27 = smov 8   ;;  %s810_s25 = int_to_ptr.vmem [resolvable:$true] %s809_s25 }
  0x1d   :  { %1038 = vmatpush.bf16.msra.mxu3 %v1010_v0  ;;  %v1005_v5 = vld [vmem:[#allocation7 + $0x10] sm:$0xff]  ;;  %v1004_v6 = vld [vmem:[#allocation7 + $0x8] sm:$0xff]  ;;  %v1003_v7 = vld [vmem:[#allocation7] sm:$0xff] }
  0x1e   :  { %v995_v8 = vld [vmem:[#allocation2] sm:$0xff]  ;;  %v1001_v10 = vld [vmem:[#allocation2 + $0x30] sm:$0xff]  ;;  %v996_v11 = vld [vmem:[#allocation2 + $0x8] sm:$0xff] }
  0x1f   :  { %v999_v9 = vld [vmem:[#allocation2 + $0x20] sm:$0xff]  ;;  %v1000_v12 = vld [vmem:[#allocation2 + $0x28] sm:$0xff]  ;;  %v1002_v13 = vld [vmem:[#allocation2 + $0x38] sm:$0xff] }
  0x20   :  { %263 = vmatpush.bf16.msra.mxu0 %v1009_v1  ;;  %1039 = vmatpush.bf16.msra.mxu2 %v1009_v1  ;;  %v997_v14 = vld [vmem:[#allocation2 + $0x10] sm:$0xff]  ;;  %v998_v15 = vld [vmem:[#allocation2 + $0x18] sm:$0xff]  ;;  %v1395_v20 = vld [vmem:[%s1545_s3] ss:$0 sm:$0xff] }
  0x21   :  { %1040 = vmatpush.bf16.msra.mxu3 %v1009_v1 }
  0x24   :  { %264 = vmatpush.bf16.msra.mxu0 %v1008_v2  ;;  %1041 = vmatpush.bf16.msra.mxu2 %v1008_v2 }
  0x25   :  { %1042 = vmatpush.bf16.msra.mxu3 %v1008_v2 }
  0x28   :  { %265 = vmatpush.bf16.msra.mxu0 %v1007_v3  ;;  %1043 = vmatpush.bf16.msra.mxu2 %v1007_v3 }
  0x29   :  { %1044 = vmatpush.bf16.msra.mxu3 %v1007_v3 }
  0x2c   :  { %266 = vmatpush.bf16.msra.mxu0 %v1006_v4  ;;  %1045 = vmatpush.bf16.msra.mxu2 %v1006_v4 }
  0x2d   :  { %1046 = vmatpush.bf16.msra.mxu3 %v1006_v4 }
  0x30   :  { %267 = vmatpush.bf16.msra.mxu0 %v1005_v5  ;;  %1047 = vmatpush.bf16.msra.mxu2 %v1005_v5 }
  0x31   :  { %1048 = vmatpush.bf16.msra.mxu3 %v1005_v5 }
  0x34   :  { %268 = vmatpush.bf16.msra.mxu0 %v1004_v6  ;;  %1049 = vmatpush.bf16.msra.mxu2 %v1004_v6 }
  0x35   :  { %1050 = vmatpush.bf16.msra.mxu3 %v1004_v6 }
  0x38   :  { %269 = vmatpush.bf16.msra.mxu0 %v1003_v7  ;;  %1051 = vmatpush.bf16.msra.mxu2 %v1003_v7 }
  0x39   :  { %1052 = vmatpush.bf16.msra.mxu3 %v1003_v7 }
  0x3b   :  { %270 = vmatmul.bf16.vlgmr.msra.gmra.mxu0 %v995_v8  ;;  %290 = vmatmul.bf16.vlgmr.msra.gmra.mxu2 %v999_v9 }
  0x3c   :  { %300 = vmatmul.bf16.vlgmr.msra.gmra.mxu3 %v1001_v10 }
  0x4b   :  { %275 = vmatmul.bf16.gmra.mxu0 %v996_v11  ;;  %295 = vmatmul.bf16.gmra.mxu2 %v1000_v12 }
  0x4c   :  { %305 = vmatmul.bf16.gmra.mxu3 %v1002_v13 }
  0x5b   :  { %280 = vmatmul.bf16.gmra.mxu0 %v997_v14 }
  0x6b   :  { %285 = vmatmul.bf16.gmra.mxu0 %v998_v15 }
  0xb8   :  { %v1388_v16 = vpop.f32.mrf.mxu0 }
  0xbe   :  { %v291_v17 = vpop.f32.mrf.mxu2 }
  0xbf   :  { %v301_v18 = vpop.f32.mrf.mxu3  ;;  %v1420_v35 = vadd.f32 %v1395_v20, %v291_v17 }
  0xc0   :  { %v1390_v19 = vpop.f32.mrf.mxu0  ;;  %v1403_v25 = vadd.f32 %v1395_v20, %v301_v18 }
  0xc1   :  { %v319_v42 = vmul.f32 %v1420_v35, %v1420_v35 }
  0xc2   :  { %v323_v27 = vmul.f32 %v1403_v25, %v1403_v25 }
  0xc3   :  { %v335_v54 = vmul.f32 %v319_v42, %v1420_v35 }
  0xc4   :  { %v339_v36 = vmul.f32 %v323_v27, %v1403_v25  ;;  %v1468_v27 = vadd.f32 %v1395_v20, %v1390_v19 }
  0xc5   :  { %v351_v0 = vmul.f32 0.044715, %v335_v54 }
  0xc6   :  { %v293_v21 = vpop.f32.mrf.mxu2  ;;  %v355_v43 = vmul.f32 0.044715, %v339_v36  ;;  %v312_v42 = vmul.f32 %v1468_v27, %v1468_v27 }
  0xc7   :  { %v303_v22 = vpop.f32.mrf.mxu3  ;;  %v1410_v29 = vadd.f32 %v1395_v20, %v293_v21  ;;  %v367_v9 = vadd.f32 %v351_v0, %v1420_v35 }
  0xc8   :  { %v1398_v23 = vadd.f32 %v1395_v20, %v303_v22  ;;  %v1400_v24 = vpop.f32.mrf.mxu0  ;;  %v371_v55 = vadd.f32 %v355_v43, %v1403_v25 }
  0xc9   :  { %v320_v39 = vmul.f32 %v1410_v29, %v1410_v29 }
  0xca   :  { %v324_v26 = vmul.f32 %v1398_v23, %v1398_v23  ;;  %v387_v2 = vmul.f32 0.7978846, %v371_v55 }
  0xcb   :  { %v336_v47 = vmul.f32 %v320_v39, %v1410_v29 }
  0xcc   :  { %v340_v30 = vmul.f32 %v324_v26, %v1398_v23  ;;  %v383_v26 = vmul.f32 0.7978846, %v367_v9 }
  0xcd   :  { %v352_v60 = vmul.f32 0.044715, %v336_v47 }
  0xce   :  { %v296_v28 = vpop.f32.mrf.mxu2  ;;  %v356_v40 = vmul.f32 0.044715, %v340_v30 }
  0xcf   :  { %v1414_v31 = vadd.f32 %v1395_v20, %v296_v28  ;;  %v306_v32 = vpop.f32.mrf.mxu3  ;;  %v368_v5 = vadd.f32 %v352_v60, %v1410_v29  ;;  %v1472_v28 = vadd.f32 %v1395_v20, %v1400_v24 }
  0xd0   :  { %v1417_v33 = vadd.f32 %v1395_v20, %v306_v32  ;;  %v278_v34 = vpop.f32.mrf.mxu0  ;;  %v372_v48 = vadd.f32 %v356_v40, %v1398_v23  ;;  %v1481_v40 = vadd.f32 %v1395_v20, %v1388_v16 }
  0xd1   :  { %v321_v37 = vmul.f32 %v1414_v31, %v1414_v31  ;;  %v384_v15 = vmul.f32 0.7978846, %v368_v5  ;;  %v1462_v18 = vadd.f32 %v1395_v20, %v278_v34  ;;  %v313_v43 = vmul.f32 %v1472_v28, %v1472_v28 }
  0xd2   :  { %v325_v38 = vmul.f32 %v1417_v33, %v1417_v33  ;;  %v388_v62 = vmul.f32 0.7978846, %v372_v48  ;;  %v311_v55 = vmul.f32 %v1481_v40, %v1481_v40 }
  0xd3   :  { %v337_v44 = vmul.f32 %v321_v37, %v1414_v31  ;;  %v314_v36 = vmul.f32 %v1462_v18, %v1462_v18  ;;  %v329_v60 = vmul.f32 %v313_v43, %v1472_v28 }
  0xd4   :  { %v341_v41 = vmul.f32 %v325_v38, %v1417_v33 }
  0xd5   :  { %v353_v57 = vmul.f32 0.044715, %v337_v44 }
  0xd6   :  { %v357_v45 = vmul.f32 0.044715, %v341_v41  ;;  %v298_v46 = vpop.f32.mrf.mxu2 }
  0xd7   :  { %v1436_v49 = vadd.f32 %v1395_v20, %v298_v46  ;;  %v308_v50 = vpop.f32.mrf.mxu3  ;;  %v369_v3 = vadd.f32 %v353_v57, %v1414_v31 }
  0xd8   :  { %v1439_v51 = vadd.f32 %v1395_v20, %v308_v50  ;;  %v281_v52 = vpop.f32.mrf.mxu0  ;;  %v373_v53 = vadd.f32 %v357_v45, %v1417_v33  ;;  %v330_v50 = vmul.f32 %v314_v36, %v1462_v18 }
  0xd9   :  { %v322_v56 = vmul.f32 %v1436_v49, %v1436_v49  ;;  %v1459_v12 = vadd.f32 %v1395_v20, %v281_v52  ;;  %v385_v14 = vmul.f32 0.7978846, %v369_v3 }
  0xda   :  { %v326_v58 = vmul.f32 %v1439_v51, %v1439_v51  ;;  %v389_v59 = vmul.f32 0.7978846, %v373_v53 }
  0xdb   :  { %v338_v61 = vmul.f32 %v322_v56, %v1436_v49  ;;  %v315_v30 = vmul.f32 %v1459_v12, %v1459_v12 }
  0xdc   :  { %v342_v63 = vmul.f32 %v326_v58, %v1439_v51  ;;  %1068 = vtanh.f32 %v389_v59  ;;  %v328_v59 = vmul.f32 %v312_v42, %v1468_v27 }
  0xdd   :  { %v354_v1 = vmul.f32 0.044715, %v338_v61  ;;  %1070 = vtanh.f32 %v388_v62  ;;  %v331_v44 = vmul.f32 %v315_v30, %v1459_v12 }
  0xde   :  { %v358_v4 = vmul.f32 0.044715, %v342_v63  ;;  %1072 = vtanh.f32 %v387_v2  ;;  %v344_v30 = vmul.f32 0.044715, %v328_v59 }
  0xdf   :  { %v370_v6 = vadd.f32 %v354_v1, %v1436_v49  ;;  %v347_v61 = vmul.f32 0.044715, %v331_v44 }
  0xe0   :  { %v283_v7 = vpop.f32.mrf.mxu0  ;;  %v374_v8 = vadd.f32 %v358_v4, %v1439_v51  ;;  %v346_v4 = vmul.f32 0.044715, %v330_v50  ;;  %v360_v44 = vadd.f32 %v344_v30, %v1468_v27 }
  0xe1   :  { %v1456_v10 = vadd.f32 %v1395_v20, %v283_v7  ;;  %v386_v11 = vmul.f32 0.7978846, %v370_v6 }
  0xe2   :  { %v390_v13 = vmul.f32 0.7978846, %v374_v8  ;;  %v1069_v17 = vpop.eup %1068 }
  0xe3   :  { %1074 = vtanh.f32 %v386_v11  ;;  %v316_v21 = vmul.f32 %v1456_v10, %v1456_v10  ;;  %v1071_v22 = vpop.eup %1070  ;;  %v421_v34 = vadd.f32 1.0, %v1069_v17 }
  0xe4   :  { %1076 = vtanh.f32 %v390_v13  ;;  %v1073_v32 = vpop.eup %1072  ;;  %v420_v39 = vadd.f32 1.0, %v1071_v22 }
  0xe5   :  { %1078 = vtanh.f32 %v385_v14  ;;  %v332_v37 = vmul.f32 %v316_v21, %v1456_v10  ;;  %v419_v45 = vadd.f32 1.0, %v1073_v32  ;;  %v437_v16 = vmul.f32 0.5, %v421_v34 }
  0xe6   :  { %1080 = vtanh.f32 %v384_v15  ;;  %v436_v53 = vmul.f32 0.5, %v420_v39  ;;  %v327_v15 = vmul.f32 %v311_v55, %v1481_v40  ;;  %v363_v21 = vadd.f32 %v347_v61, %v1459_v12 }
  0xe7   :  { %1082 = vtanh.f32 %v383_v26  ;;  %v348_v52 = vmul.f32 0.044715, %v332_v37  ;;  %v435_v62 = vmul.f32 0.5, %v419_v45  ;;  %v453_v1 = vmul.f32 %v437_v16, %v1417_v33 }
  0xe8   :  { %v286_v38 = vpop.f32.mrf.mxu0  ;;  %v452_v7 = vmul.f32 %v436_v53, %v1398_v23  ;;  %v345_v33 = vmul.f32 0.044715, %v329_v60  ;;  %v379_v43 = vmul.f32 0.7978846, %v363_v21 }
  0xe9   :  { %v1075_v19 = vpop.eup %1074  ;;  %v1484_v24 = vadd.f32 %v1395_v20, %v286_v38  ;;  %v364_v5 = vadd.f32 %v348_v52, %v1456_v10 }
  0xea   :  { %v1077_v41 = vpop.eup %1076  ;;  %v418_v58 = vadd.f32 1.0, %v1075_v19  ;;  %v361_v39 = vadd.f32 %v345_v33, %v1472_v28  ;;  %v1020_v33 = vld [vmem:[#allocation8 + $0x38] sm:$0xff] }
  0xeb   :  { %v317_v46 = vmul.f32 %v1484_v24, %v1484_v24  ;;  %v422_v47 = vadd.f32 1.0, %v1077_v41  ;;  %v1079_v48 = vpop.eup %1078  ;;  %v380_v38 = vmul.f32 0.7978846, %v364_v5  ;;  %568 = vmatpush.bf16.msrb.mxu2 %v1020_v33 }
  0xec   :  { %v1081_v54 = vpop.eup %1080  ;;  %v417_v3 = vadd.f32 1.0, %v1079_v48  ;;  %v434_v14 = vmul.f32 0.5, %v418_v58  ;;  %v377_v52 = vmul.f32 0.7978846, %v361_v39  ;;  %v1013_v39 = vld [vmem:[#allocation8] sm:$0xff] }
  0xed   :  { %v333_v56 = vmul.f32 %v317_v46, %v1484_v24  ;;  %v438_v57 = vmul.f32 0.5, %v422_v47  ;;  %v1083_v63 = vpop.eup %1082  ;;  %v416_v8 = vadd.f32 1.0, %v1081_v54  ;;  %v376_v54 = vmul.f32 0.7978846, %v360_v44 }
  0xee   :  { %v415_v17 = vadd.f32 1.0, %v1083_v63  ;;  %v433_v23 = vmul.f32 0.5, %v417_v3  ;;  %v450_v37 = vmul.f32 %v434_v14, %v1436_v49 }
  0xef   :  { %v349_v0 = vmul.f32 0.044715, %v333_v56  ;;  %v454_v2 = vmul.f32 %v438_v57, %v1439_v51  ;;  %v451_v51 = vmul.f32 %v435_v62, %v1403_v25  ;;  %v432_v32 = vmul.f32 0.5, %v416_v8 }
  0xf0   :  { %v288_v6 = vpop.f32.mrf.mxu0  ;;  %v343_v25 = vmul.f32 0.044715, %v327_v15  ;;  %v431_v19 = vmul.f32 0.5, %v415_v17  ;;  %v449_v42 = vmul.f32 %v433_v23, %v1414_v31 }
  0xf1   :  { %v365_v9 = vadd.f32 %v349_v0, %v1484_v24  ;;  %v1505_v11 = vadd.f32 %v1395_v20, %v288_v6  ;;  %v466_v13 = vpack.c.bf16 %v454_v2, %v453_v1  ;;  %v362_v20 = vadd.f32 %v346_v4, %v1462_v18 }
  0xf2   :  { %v465_v36 = vpack.c.bf16 %v452_v7, %v451_v51  ;;  %v464_v47 = vpack.c.bf16 %v450_v37, %v449_v42  ;;  %v448_v16 = vmul.f32 %v432_v32, %v1410_v29  ;;  %v359_v49 = vadd.f32 %v343_v25, %v1481_v40  ;;  %v1011_v37 = vld [vmem:[#allocation5] sm:$0xff]  ;;  %v1014_v25 = vld [vmem:[#allocation8 + $0x8] sm:$0xff]  ;;  %v1025_v42 = vld [vmem:[#allocation10 + $0x20] sm:$0xff] }
  0xf3   :  { %v318_v22 = vmul.f32 %v1505_v11, %v1505_v11  ;;  %479 = vmatpush.bf16.msra.mxu1 %v466_v13  ;;  %v381_v26 = vmul.f32 0.7978846, %v365_v9  ;;  %v378_v45 = vmul.f32 0.7978846, %v362_v20  ;;  %v447_v48 = vmul.f32 %v431_v19, %v1420_v35 }
  0xf4   :  { %v375_v56 = vmul.f32 0.7978846, %v359_v49  ;;  %v1023_v49 = vld [vmem:[#allocation10 + $0x10] sm:$0xff] }
  0xf5   :  { %v334_v34 = vmul.f32 %v318_v22, %v1505_v11  ;;  %1084 = vtanh.f32 %v381_v26  ;;  %v463_v53 = vpack.c.bf16 %v448_v16, %v447_v48  ;;  %v1019_v22 = vld [vmem:[#allocation8 + $0x30] sm:$0xff]  ;;  %v1022_v48 = vld [vmem:[#allocation10 + $0x8] sm:$0xff] }
  0xf6   :  { %1086 = vtanh.f32 %v380_v38  ;;  %569 = vmatpush.bf16.msrb.mxu2 %v1019_v22  ;;  %v1015_v38 = vld [vmem:[#allocation8 + $0x10] sm:$0xff] }
  0xf7   :  { %v350_v41 = vmul.f32 0.044715, %v334_v34  ;;  %480 = vmatpush.bf16.msra.mxu1 %v465_v36  ;;  %1088 = vtanh.f32 %v379_v43  ;;  %v1017_v34 = vld [vmem:[#allocation8 + $0x20] sm:$0xff] }
  0xf8   :  { %1090 = vtanh.f32 %v378_v45  ;;  %v1024_v45 = vld [vmem:[#allocation10 + $0x18] sm:$0xff] }
  0xf9   :  { %v366_v46 = vadd.f32 %v350_v41, %v1505_v11  ;;  %v1026_v41 = vld [vmem:[#allocation10 + $0x28] sm:$0xff] }
  0xfb   :  { %481 = vmatpush.bf16.msra.mxu1 %v464_v47  ;;  %v382_v50 = vmul.f32 0.7978846, %v366_v46  ;;  %v1085_v31 = vpop.eup %1084 }
  0xfc   :  { %v1087_v55 = vpop.eup %1086  ;;  %v413_v57 = vadd.f32 1.0, %v1085_v31  ;;  %v1065_v31 = vld [vmem:[%s1547_s5] ss:$0 sm:$0xff] }
  0xfd   :  { %1092 = vtanh.f32 %v382_v50  ;;  %v1089_v29 = vpop.eup %1088  ;;  %v412_v59 = vadd.f32 1.0, %v1087_v55  ;;  %v1021_v50 = vld [vmem:[#allocation10] sm:$0xff] }
  0xfe   :  { %1094 = vtanh.f32 %v377_v52  ;;  %v1091_v58 = vpop.eup %1090  ;;  %v429_v61 = vmul.f32 0.5, %v413_v57  ;;  %v411_v62 = vadd.f32 1.0, %v1089_v29 }
  0xff   :  { %482 = vmatpush.bf16.msra.mxu1 %v463_v53  ;;  %1096 = vtanh.f32 %v376_v54  ;;  %v428_v1 = vmul.f32 0.5, %v412_v59  ;;  %v410_v2 = vadd.f32 1.0, %v1091_v58 }
 0x100   :  { %1098 = vtanh.f32 %v375_v56  ;;  %v445_v4 = vmul.f32 %v429_v61, %v1484_v24  ;;  %v427_v6 = vmul.f32 0.5, %v411_v62  ;;  %v1035_v61 = vld [vmem:[#allocation11 + $0x30] sm:$0xff]  ;;  %v1034_v62 = vld [vmem:[#allocation11 + $0x28] sm:$0xff] }
 0x101   :  { %v444_v13 = vmul.f32 %v428_v1, %v1456_v10  ;;  %v426_v14 = vmul.f32 0.5, %v410_v2  ;;  %v1018_v10 = vld [vmem:[#allocation8 + $0x28] sm:$0xff]  ;;  %v1031_v1 = vld [vmem:[#allocation11 + $0x10] sm:$0xff] }
 0x102   :  { %v443_v51 = vmul.f32 %v427_v6, %v1459_v12  ;;  %570 = vmatpush.bf16.msrb.mxu2 %v1018_v10  ;;  %v1066_v2 = vld [vmem:[%s1549_s7] ss:$0 sm:$0xff]  ;;  %v1029_v6 = vld [vmem:[#allocation11] sm:$0xff] }
 0x103   :  { %v1093_v60 = vpop.eup %1092  ;;  %v442_v24 = vmul.f32 %v426_v14, %v1462_v18  ;;  %v1016_v18 = vld [vmem:[#allocation8 + $0x18] sm:$0xff] }
 0x104   :  { %v414_v35 = vadd.f32 1.0, %v1093_v60  ;;  %v1095_v63 = vpop.eup %1094  ;;  %v461_v23 = vpack.c.bf16 %v444_v13, %v443_v51 }
 0x105   :  { %v1097_v3 = vpop.eup %1096  ;;  %v409_v7 = vadd.f32 1.0, %v1095_v63  ;;  %v1033_v63 = vld [vmem:[#allocation11 + $0x20] sm:$0xff] }
 0x106   :  { %v430_v0 = vmul.f32 0.5, %v414_v35  ;;  %v1099_v8 = vpop.eup %1098  ;;  %v408_v15 = vadd.f32 1.0, %v1097_v3  ;;  %571 = vmatpush.bf16.msrb.mxu2 %v1017_v34  ;;  %v1036_v35 = vld [vmem:[#allocation11 + $0x38] sm:$0xff]  ;;  %v1030_v3 = vld [vmem:[#allocation11 + $0x8] sm:$0xff] }
 0x107   :  { %v425_v17 = vmul.f32 0.5, %v409_v7  ;;  %v407_v21 = vadd.f32 1.0, %v1099_v8 }
 0x108   :  { %v446_v5 = vmul.f32 %v430_v0, %v1505_v11  ;;  %v424_v11 = vmul.f32 0.5, %v408_v15  ;;  %v1032_v0 = vld [vmem:[#allocation11 + $0x18] sm:$0xff] }
 0x109   :  { %v441_v26 = vmul.f32 %v425_v17, %v1472_v28  ;;  %v423_v30 = vmul.f32 0.5, %v407_v21  ;;  %v1012_v28 = vld [vmem:[#allocation5 + $0x8] sm:$0xff] }
 0x10a   :  { %v462_v9 = vpack.c.bf16 %v446_v5, %v445_v4  ;;  %v440_v32 = vmul.f32 %v424_v11, %v1468_v27  ;;  %572 = vmatpush.bf16.msrb.mxu2 %v1016_v18  ;;  %v1028_v27 = vld [vmem:[#allocation10 + $0x38] sm:$0xff] }
 0x10b   :  { %v460_v20 = vpack.c.bf16 %v442_v24, %v441_v26  ;;  %v439_v12 = vmul.f32 %v423_v30, %v1481_v40  ;;  %657 = vmatpush.bf16.msrb.mxu3 %v1028_v27  ;;  %v1027_v40 = vld [vmem:[#allocation10 + $0x30] sm:$0xff] }
 0x10c   :  { %483 = vmatpush.bf16.msra.mxu1 %v462_v9 }
 0x10d   :  { %v459_v36 = vpack.c.bf16 %v440_v32, %v439_v12 }
 0x10e   :  { %573 = vmatpush.bf16.msrb.mxu2 %v1015_v38 }
 0x10f   :  { %658 = vmatpush.bf16.msrb.mxu3 %v1027_v40 }
 0x110   :  { %484 = vmatpush.bf16.msra.mxu1 %v461_v23 }
 0x112   :  { %574 = vmatpush.bf16.msrb.mxu2 %v1014_v25 }
 0x113   :  { %659 = vmatpush.bf16.msrb.mxu3 %v1026_v41 }
 0x114   :  { %485 = vmatpush.bf16.msra.mxu1 %v460_v20 }
 0x116   :  { %575 = vmatpush.bf16.msrb.mxu2 %v1013_v39 }
 0x117   :  { %660 = vmatpush.bf16.msrb.mxu3 %v1025_v42 }
 0x118   :  { %486 = vmatpush.bf16.msra.mxu1 %v459_v36 }
 0x11b   :  { %487 = vmatmul.bf16.vlgmr.msra.gmra.mxu1 %v1011_v37  ;;  %661 = vmatpush.bf16.msrb.mxu3 %v1024_v45 }
 0x11c   :  { %782 = vmatpush.bf16.msrb.mxu1 %v1036_v35 }
 0x11f   :  { %662 = vmatpush.bf16.msrb.mxu3 %v1023_v49 }
 0x120   :  { %783 = vmatpush.bf16.msrb.mxu1 %v1035_v61 }
 0x123   :  { %663 = vmatpush.bf16.msrb.mxu3 %v1022_v48 }
 0x124   :  { %784 = vmatpush.bf16.msrb.mxu1 %v1034_v62 }
 0x127   :  { %664 = vmatpush.bf16.msrb.mxu3 %v1021_v50 }
 0x128   :  { %785 = vmatpush.bf16.msrb.mxu1 %v1033_v63 }
 0x12b   :  { %492 = vmatmul.bf16.gmra.mxu1 %v1012_v28 }
 0x12c   :  { %786 = vmatpush.bf16.msrb.mxu1 %v1032_v0 }
 0x130   :  { %787 = vmatpush.bf16.msrb.mxu1 %v1031_v1 }
 0x134   :  { %788 = vmatpush.bf16.msrb.mxu1 %v1030_v3 }
 0x138   :  { %789 = vmatpush.bf16.msrb.mxu1 %v1029_v6 }
 0x198   :  { %v488_v19 = vpop.f32.mrf.mxu1 }
 0x1a0   :  { %v490_v43 = vpop.f32.mrf.mxu1 }
 0x1a1   :  { %v498_v44 = vpack.c.bf16 %v490_v43, %v488_v19 }
 0x1a3   :  { %576 = vmatmul.bf16.vlgmr.msrb.gmra.mxu2 %v498_v44 }
 0x1a8   :  { %v493_v46 = vpop.f32.mrf.mxu1 }
 0x1b0   :  { %v495_v47 = vpop.f32.mrf.mxu1 }
 0x1b1   :  { %v499_v16 = vpack.c.bf16 %v495_v47, %v493_v46 }
 0x1b3   :  { %581 = vmatmul.bf16.gmra.mxu2 %v499_v16 }
 0x226   :  { %v577_v52 = vpop.f32.mrf.mxu2 }
 0x227   :  { %v578_v54 = vadd.f32 %v1065_v31, %v577_v52 }
 0x22e   :  { %v579_v53 = vpop.f32.mrf.mxu2 }
 0x22f   :  { %v580_v55 = vadd.f32 %v1065_v31, %v579_v53  ;;  %v1067_v53 = vld [vmem:[%s1551_s9] ss:$0 sm:$0xff]  ;;  %s1295_s9 = smov 128  }
 0x231   :  { %v587_v56 = vpack.c.bf16 %v580_v55, %v578_v54 }
 0x233   :  { %665 = vmatmul.bf16.vlgmr.msrb.gmra.mxu3 %v587_v56 }
 0x236   :  { %v582_v57 = vpop.f32.mrf.mxu2 }
 0x237   :  { %v583_v58 = vadd.f32 %v1065_v31, %v582_v57 }
 0x23e   :  { %v584_v29 = vpop.f32.mrf.mxu2 }
 0x23f   :  { %v585_v59 = vadd.f32 %v1065_v31, %v584_v29 }
 0x241   :  { %v588_v60 = vpack.c.bf16 %v585_v59, %v583_v58 }
 0x243   :  { %670 = vmatmul.bf16.gmra.mxu3 %v588_v60 }
 0x2b6   :  { %v666_v4 = vpop.f32.mrf.mxu3 }
 0x2b7   :  { %v667_v5 = vadd.f32 %v1066_v2, %v666_v4 }
 0x2b9   :  { %v676_v7 = vmul.f32 %v667_v5, %v667_v5 }
 0x2bb   :  { %v680_v8 = vmul.f32 %v676_v7, %v667_v5 }
 0x2bd   :  { %v684_v9 = vmul.f32 0.044715, %v680_v8 }
 0x2be   :  { %v668_v13 = vpop.f32.mrf.mxu3 }
 0x2bf   :  { %v688_v14 = vadd.f32 %v684_v9, %v667_v5  ;;  %v669_v15 = vadd.f32 %v1066_v2, %v668_v13 }
 0x2c1   :  { %v692_v33 = vmul.f32 0.7978846, %v688_v14  ;;  %v677_v51 = vmul.f32 %v669_v15, %v669_v15 }
 0x2c3   :  { %v681_v17 = vmul.f32 %v677_v51, %v669_v15  ;;  %1100 = vtanh.f32 %v692_v33 }
 0x2c5   :  { %v685_v21 = vmul.f32 0.044715, %v681_v17 }
 0x2c6   :  { %v671_v22 = vpop.f32.mrf.mxu3 }
 0x2c7   :  { %v689_v23 = vadd.f32 %v685_v21, %v669_v15  ;;  %v672_v24 = vadd.f32 %v1066_v2, %v671_v22 }
 0x2c9   :  { %v693_v11 = vmul.f32 0.7978846, %v689_v23  ;;  %v678_v26 = vmul.f32 %v672_v24, %v672_v24  ;;  %v1101_v30 = vpop.eup %1100 }
 0x2ca   :  { %v700_v12 = vadd.f32 1.0, %v1101_v30 }
 0x2cb   :  { %1102 = vtanh.f32 %v693_v11  ;;  %v682_v10 = vmul.f32 %v678_v26, %v672_v24 }
 0x2cc   :  { %v704_v25 = vmul.f32 0.5, %v700_v12 }
 0x2cd   :  { %v686_v20 = vmul.f32 0.044715, %v682_v10 }
 0x2ce   :  { %v673_v32 = vpop.f32.mrf.mxu3  ;;  %v708_v19 = vmul.f32 %v704_v25, %v667_v5 }
 0x2cf   :  { %v690_v34 = vadd.f32 %v686_v20, %v672_v24  ;;  %v674_v36 = vadd.f32 %v1066_v2, %v673_v32 }
 0x2d1   :  { %v1103_v37 = vpop.eup %1102  ;;  %v679_v18 = vmul.f32 %v674_v36, %v674_v36  ;;  %v694_v38 = vmul.f32 0.7978846, %v690_v34 }
 0x2d2   :  { %v701_v28 = vadd.f32 1.0, %v1103_v37 }
 0x2d3   :  { %v683_v39 = vmul.f32 %v679_v18, %v674_v36  ;;  %1104 = vtanh.f32 %v694_v38 }
 0x2d4   :  { %v705_v27 = vmul.f32 0.5, %v701_v28 }
 0x2d5   :  { %v687_v40 = vmul.f32 0.044715, %v683_v39 }
 0x2d6   :  { %v709_v41 = vmul.f32 %v705_v27, %v669_v15 }
 0x2d7   :  { %v691_v42 = vadd.f32 %v687_v40, %v674_v36 }
 0x2d8   :  { %v712_v43 = vpack.c.bf16 %v709_v41, %v708_v19 }
 0x2d9   :  { %v695_v44 = vmul.f32 0.7978846, %v691_v42  ;;  %v1105_v45 = vpop.eup %1104 }
 0x2da   :  { %790 = vmatmul.bf16.vlgmr.msrb.gmra.mxu1 %v712_v43  ;;  %v702_v46 = vadd.f32 1.0, %v1105_v45 }
 0x2db   :  { %1106 = vtanh.f32 %v695_v44 }
 0x2dc   :  { %v706_v49 = vmul.f32 0.5, %v702_v46 }
 0x2de   :  { %v710_v50 = vmul.f32 %v706_v49, %v672_v24 }
 0x2e1   :  { %v1107_v47 = vpop.eup %1106 }
 0x2e2   :  { %v703_v16 = vadd.f32 1.0, %v1107_v47 }
 0x2e4   :  { %v707_v48 = vmul.f32 0.5, %v703_v16 }
 0x2e6   :  { %v711_v52 = vmul.f32 %v707_v48, %v674_v36 }
 0x2e8   :  { %v713_v31 = vpack.c.bf16 %v711_v52, %v710_v50 }
 0x2ea   :  { %795 = vmatmul.bf16.gmra.mxu1 %v713_v31 }
 0x357   :  { %v791_v54 = vpop.f32.mrf.mxu1 }
 0x358   :  { %v792_v55 = vadd.f32 %v1067_v53, %v791_v54 }
 0x35a   :  { %801 = vst [vmem:[#allocation13] sm:$0xff] %v792_v55 }
 0x35f   :  { %v793_v56 = vpop.f32.mrf.mxu1 }
 0x360   :  { %v794_v57 = vadd.f32 %v1067_v53, %v793_v56 }
 0x362   :  { %802 = vst [vmem:[#allocation13 + $0x8] sm:$0xff] %v794_v57 }
 0x367   :  { %v796_v29 = vpop.f32.mrf.mxu1 }
 0x368   :  { %v797_v58 = vadd.f32 %v1067_v53, %v796_v29 }
 0x36a   :  { %803 = vst [vmem:[#allocation13 + $0x10] sm:$0xff] %v797_v58 }
 0x36f   :  { %v798_v59 = vpop.f32.mrf.mxu1 }
 0x370   :  { %v799_v60 = vadd.f32 %v1067_v53, %v798_v59 }
 0x372   :  { %804 = vst [vmem:[#allocation13 + $0x18] sm:$0xff] %v799_v60 }
 0x373   :  { %817 = dma.vmem_to_hbm [thread:$0]  %s810_s25, 512, %s812_s4, [#allocation4], %s1295_s9, %s1295_s9, %s1296_s27  }
 0x374   :  { %1284 = dma.done.wait [#allocation4], 512  }
 0x375   :  { %1285 = vsyncadd [#allocation4], 4294966784 }
 0x376   :  { %822 = vsyncpa [#allocation3], 1 }
 0x377   :  { %823 = vsyncpa [#allocation6], 1 }
 0x378   :  { %824 = vsyncpa [#allocation9], 1 }
 0x379   :  { %825 = vsyncpa [#allocation12], 1 }
 0x37a   :  { %826 = vsyncpa [#allocation4], 1 }

</bundles_post_ra>
